<compile_context>
chip_gen: v7x
topology: tpu7x:2x2x1
jax: 0.10.0
libtpu: 0.0.40
codegen_flags: <defaults>
</compile_context>

<pallas_src>
import jax
import jax.numpy as jnp
from jax.experimental import pallas as pl
from jax.experimental.pallas import tpu as pltpu

# Logical (PyTorch) dims.
D_IN, D_H, D_OUT = 320, 50, 10


# --------------------------------------------------------------------------
# Fused kernel: logits = (relu(x @ W1 + b1)) @ W2 + b2 ; also emit e1 = relu(.)
# --------------------------------------------------------------------------
def _net1_clf_kernel(x_ref, w1_ref, b1_ref, w2_ref, b2_ref, logits_ref, e1_ref):
    # x_ref:      (TM, 320)
    # w1_ref:     (320, 50)    b1_ref: (1, 50)
    # w2_ref:     (50, 10)     b2_ref: (1, 10)
    # logits_ref: (TM, 10)     e1_ref: (TM, 50)
    x = x_ref[...]

    h = jnp.dot(x, w1_ref[...], preferred_element_type=jnp.float32)
    h = h + b1_ref[...].astype(jnp.float32)
    e1 = jnp.maximum(h, 0.0)                     # ReLU
    e1_ref[...] = e1.astype(e1_ref.dtype)

    # TODO(synk): F.dropout with training=True (stochastic masking + 1/(1-p)
    # scaling) is not implemented; this is the eval-mode (identity) forward.

    y = jnp.dot(e1.astype(w2_ref.dtype), w2_ref[...],
                preferred_element_type=jnp.float32)
    y = y + b2_ref[...].astype(jnp.float32)
    logits_ref[...] = y.astype(logits_ref.dtype)


def net1_clf_forward(x, params, *, block_m=512):
    """x: (N, 320) float32. Returns (logits (N, 10), e1 (N, 50))."""
    m, d = x.shape
    assert d == D_IN, f"expected feature dim {D_IN}, got {d}"

    # Batch tile: full batch if it is small, otherwise a bounded multiple-of-8
    # tile so VMEM stays small and the pipeline overlaps DMA with compute.
    tm = m if m <= block_m else block_m
    grid = (pl.cdiv(m, tm),)

    logits, e1 = pl.pallas_call(
        _net1_clf_kernel,
        out_shape=(
            jax.ShapeDtypeStruct((m, D_OUT), x.dtype),   # logits (unpadded)
            jax.ShapeDtypeStruct((m, D_H), x.dtype),     # e1     (unpadded)
        ),
        grid_spec=pl.GridSpec(
            grid=grid,
            in_specs=[
                pl.BlockSpec((tm, D_IN), lambda i: (i, 0)),      # x tile
                pl.BlockSpec((D_IN, D_H), lambda i: (0, 0)),     # w1 resident
                pl.BlockSpec((1, D_H), lambda i: (0, 0)),        # b1 resident
                pl.BlockSpec((D_H, D_OUT), lambda i: (0, 0)),    # w2 resident
                pl.BlockSpec((1, D_OUT), lambda i: (0, 0)),      # b2 resident
            ],
            out_specs=(
                pl.BlockSpec((tm, D_OUT), lambda i: (i, 0)),
                pl.BlockSpec((tm, D_H), lambda i: (i, 0)),
            ),
        ),
        compiler_params=pltpu.CompilerParams(
            dimension_semantics=("parallel",)),   # shards tiles across v7x TCs
    )(x, params["w1"], params["b1"], params["w2"], params["b2"])

    return logits, e1


# --------------------------------------------------------------------------
# Parameters (PyTorch nn.Linear default init), stored as (K, N) = W_torch.T.
# --------------------------------------------------------------------------
def init_params(key):
    k1, k2, k3, k4 = jax.random.split(key, 4)
    lim1 = 1.0 / jnp.sqrt(jnp.float32(D_IN))
    lim2 = 1.0 / jnp.sqrt(jnp.float32(D_H))
    w1 = jax.random.uniform(k1, (D_IN, D_H), jnp.float32, -lim1, lim1)
    b1 = jax.random.uniform(k2, (1, D_H), jnp.float32, -lim1, lim1)
    w2 = jax.random.uniform(k3, (D_H, D_OUT), jnp.float32, -lim2, lim2)
    b2 = jax.random.uniform(k4, (1, D_OUT), jnp.float32, -lim2, lim2)
    return {"w1": w1, "b1": b1, "w2": w2, "b2": b2}


if __name__ == "__main__":
    key = jax.random.PRNGKey(0)
    kx, kp = jax.random.split(key)

    # Batch is a multiple of 8 (fills f32 sublanes); block_m=8 exercises a
    # multi-step pipelined grid even at this small test size.
    M = 24
    x = jax.random.normal(kx, (M, D_IN), jnp.float32)
    params = init_params(kp)

    fwd = jax.jit(lambda x, p: net1_clf_forward(x, p, block_m=8))
    logits, e1 = fwd(x, params)
    jax.block_until_ready((logits, e1))

    assert logits.shape == (M, D_OUT), logits.shape
    assert e1.shape == (M, D_H), e1.shape

    # Pure-JAX reference check (same math).
    e1_ref = jnp.maximum(x @ params["w1"] + params["b1"], 0.0)
    logits_ref = e1_ref @ params["w2"] + params["b2"]
    assert jnp.allclose(e1, e1_ref, atol=1e-5, rtol=1e-5)
    assert jnp.allclose(logits, logits_ref, atol=1e-5, rtol=1e-5)
    assert bool(jnp.all(jnp.isfinite(logits)))

    # Also check the default (single-tile) path.
    logits2, e12 = jax.jit(net1_clf_forward)(x, params)
    jax.block_until_ready((logits2, e12))
    assert jnp.allclose(logits2, logits_ref, atol=1e-5, rtol=1e-5)
    assert jnp.allclose(e12, e1_ref, atol=1e-5, rtol=1e-5)

    print("KERNEL_OK")
</pallas_src>

<mosaic_0001>
module attributes {stable_mosaic.version = 11 : i64} {
  func.func @_net1_clf_kernel(%arg0: i32, %arg1: memref<8x320xf32, #tpu.memory_space<vmem>>, %arg2: memref<320x50xf32, #tpu.memory_space<vmem>>, %arg3: memref<1x50xf32, #tpu.memory_space<vmem>>, %arg4: memref<50x10xf32, #tpu.memory_space<vmem>>, %arg5: memref<1x10xf32, #tpu.memory_space<vmem>>, %arg6: memref<8x10xf32, #tpu.memory_space<vmem>>, %arg7: memref<8x50xf32, #tpu.memory_space<vmem>>) attributes {dimension_semantics = [#tpu.dimension_semantics<parallel>], iteration_bounds = array<i64: 3>, scalar_prefetch = 0 : i64, scratch_operands = 0 : i64, tpu.core_type = #tpu.core_type<tc>, window_params = [{transform_indices = @transform_0, window_bounds = array<i64: 8, 320>}, {pipeline_mode = #tpu.pipeline_mode<synchronous>, transform_indices = @transform_1, window_bounds = array<i64: 320, 50>}, {pipeline_mode = #tpu.pipeline_mode<synchronous>, transform_indices = @transform_2, window_bounds = array<i64: 1, 50>}, {pipeline_mode = #tpu.pipeline_mode<synchronous>, transform_indices = @transform_3, window_bounds = array<i64: 50, 10>}, {pipeline_mode = #tpu.pipeline_mode<synchronous>, transform_indices = @transform_4, window_bounds = array<i64: 1, 10>}, {transform_indices = @transform_5, window_bounds = array<i64: 8, 10>}, {transform_indices = @transform_6, window_bounds = array<i64: 8, 50>}]} {
    %c0 = arith.constant 0 : index
    %c0_0 = arith.constant 0 : index
    %0 = vector.load %arg1[%c0, %c0_0] : memref<8x320xf32, #tpu.memory_space<vmem>>, vector<8x320xf32>
    %c0_1 = arith.constant 0 : index
    %c0_2 = arith.constant 0 : index
    %1 = vector.load %arg2[%c0_1, %c0_2] : memref<320x50xf32, #tpu.memory_space<vmem>>, vector<320x50xf32>
    %cst = arith.constant dense<0.000000e+00> : vector<8x50xf32>
    %2 = tpu.matmul %0, %1, %cst {dimension_numbers = #tpu.dot_dimension_numbers<[1], [0], [0], [1], [0, 0, 1, 1], [], []>} : vector<8x320xf32>, vector<320x50xf32>, vector<8x50xf32> -> vector<8x50xf32>
    %c0_3 = arith.constant 0 : index
    %c0_4 = arith.constant 0 : index
    %3 = vector.load %arg3[%c0_3, %c0_4] : memref<1x50xf32, #tpu.memory_space<vmem>>, vector<1x50xf32>
    %4 = vector.broadcast %3 : vector<1x50xf32> to vector<8x50xf32>
    %5 = arith.addf %2, %4 : vector<8x50xf32>
    %cst_5 = arith.constant 0.000000e+00 : f32
    %6 = vector.broadcast %cst_5 : f32 to vector<8x50xf32>
    %7 = arith.maximumf %5, %6 : vector<8x50xf32>
    %c0_6 = arith.constant 0 : index
    %c0_7 = arith.constant 0 : index
    %8 = vector.load %arg7[%c0_6, %c0_7] : memref<8x50xf32, #tpu.memory_space<vmem>>, vector<8x50xf32>
    tpu.vector_store %arg7[%c0_6, %c0_7], %7 {strides = array<i32>} : memref<8x50xf32, #tpu.memory_space<vmem>>, vector<8x50xf32>,
    %c0_8 = arith.constant 0 : index
    %c0_9 = arith.constant 0 : index
    %9 = vector.load %arg4[%c0_8, %c0_9] : memref<50x10xf32, #tpu.memory_space<vmem>>, vector<50x10xf32>
    %cst_10 = arith.constant dense<0.000000e+00> : vector<8x10xf32>
    %10 = tpu.matmul %7, %9, %cst_10 {dimension_numbers = #tpu.dot_dimension_numbers<[1], [0], [0], [1], [0, 0, 1, 1], [], []>} : vector<8x50xf32>, vector<50x10xf32>, vector<8x10xf32> -> vector<8x10xf32>
    %c0_11 = arith.constant 0 : index
    %c0_12 = arith.constant 0 : index
    %11 = vector.load %arg5[%c0_11, %c0_12] : memref<1x10xf32, #tpu.memory_space<vmem>>, vector<1x10xf32>
    %12 = vector.broadcast %11 : vector<1x10xf32> to vector<8x10xf32>
    %13 = arith.addf %10, %12 : vector<8x10xf32>
    %c0_13 = arith.constant 0 : index
    %c0_14 = arith.constant 0 : index
    %14 = vector.load %arg6[%c0_13, %c0_14] : memref<8x10xf32, #tpu.memory_space<vmem>>, vector<8x10xf32>
    tpu.vector_store %arg6[%c0_13, %c0_14], %13 {strides = array<i32>} : memref<8x10xf32, #tpu.memory_space<vmem>>, vector<8x10xf32>,
    return
  }
  func.func @transform_0(%arg0: i32) -> (i32, i32) {
    %c0_i32 = arith.constant 0 : i32
    %c0_i32_0 = arith.constant 0 : i32
    return %arg0, %c0_i32 : i32, i32
  }
  func.func @transform_1(%arg0: i32) -> (i32, i32) {
    %c0_i32 = arith.constant 0 : i32
    %c0_i32_0 = arith.constant 0 : i32
    %c0_i32_1 = arith.constant 0 : i32
    return %c0_i32, %c0_i32_0 : i32, i32
  }
  func.func @transform_2(%arg0: i32) -> (i32, i32) {
    %c0_i32 = arith.constant 0 : i32
    %c0_i32_0 = arith.constant 0 : i32
    %c0_i32_1 = arith.constant 0 : i32
    return %c0_i32, %c0_i32_0 : i32, i32
  }
  func.func @transform_3(%arg0: i32) -> (i32, i32) {
    %c0_i32 = arith.constant 0 : i32
    %c0_i32_0 = arith.constant 0 : i32
    %c0_i32_1 = arith.constant 0 : i32
    return %c0_i32, %c0_i32_0 : i32, i32
  }
  func.func @transform_4(%arg0: i32) -> (i32, i32) {
    %c0_i32 = arith.constant 0 : i32
    %c0_i32_0 = arith.constant 0 : i32
    %c0_i32_1 = arith.constant 0 : i32
    return %c0_i32, %c0_i32_0 : i32, i32
  }
  func.func @transform_5(%arg0: i32) -> (i32, i32) {
    %c0_i32 = arith.constant 0 : i32
    %c0_i32_0 = arith.constant 0 : i32
    return %arg0, %c0_i32 : i32, i32
  }
  func.func @transform_6(%arg0: i32) -> (i32, i32) {
    %c0_i32 = arith.constant 0 : i32
    %c0_i32_0 = arith.constant 0 : i32
    return %arg0, %c0_i32 : i32, i32
  }
}

</mosaic_0001>

<bundles_post_ra>
// kernel: _lambda_.1
= control target key start
LH: loop header
LB: loop body
LE: loop exit
PB: predicated region body
PF: predicated region fallthrough
CT: control target
= control target key end

     0   :  { %12 = vsyncpa [#allocation3], 0  ;;  %s1223_s0 = inlined_call_operand.vmem [shape: f32[24,320], index: 0, kind: input, shape index: {}]   ;;  %s1224_s1 = inlined_call_operand.vmem [shape: f32[320,50], index: 1, kind: input, shape index: {}]   ;;  %s1225_s2 = inlined_call_operand.vmem [shape: f32[1,50], index: 2, kind: input, shape index: {}]   ;;  %s1226_s3 = inlined_call_operand.vmem [shape: f32[50,10], index: 3, kind: input, shape index: {}]   ;;  %s1227_s4 = inlined_call_operand.vmem [shape: f32[1,10], index: 4, kind: input, shape index: {}]   ;;  %s1228_s5 = inlined_call_operand.vmem [shape: f32[24,10], index: 5, kind: output, shape index: {0}]   ;;  %s1229_s6 = inlined_call_operand.hbm [shape: f32[24,50], index: 6, kind: output, shape index: {1}]  }
   0x1   :  { %14 = vsyncpa [#allocation3 + $0x1], 0  ;;  %s958_s21 = smov 0   ;;  %s960_s22 = smov 0  }
   0x2   :  { %s962_s23 = smov 0   ;;  %s964_s24 = smov 0  }
   0x3 LB: > { %s979_s25 = sadd.s32 4294967295, %s917_s24   ;;  %s655_s26 = sadd.s32 4294967294, %s917_s24   ;;  %s917_s24 = sphi %s964_s24, %s1235_s24   ;;  %s913_s23 = sphi %s962_s23, %s1234_s23   ;;  %s909_s22 = sphi %s960_s22, %s1233_s22   ;;  %s905_s21 = sphi %s958_s21, %s1232_s21  }
   0x4   : > { %s983_s27 = sadd.s32 1, %s917_s24   ;;  %s163_s28 = sadd.s32 1, %s913_s23 }
   0x5   : > { %s160_s29 = ssub.s32 %s917_s24, %s983_s27  ;;  %p173_p0 = scmp.ne.s32.totalorder %s913_s23, %s909_s22 }
   0x6   : > { %p161_p1 = scmp.eq.s32.totalorder %s160_s29, 0  ;;  %p174_p2 = scmp.eq.s32.totalorder %s979_s25, 2 }
   0x7   : > { %p179_p3 = scmp.ne.s32.totalorder %s909_s22, %s905_s21  ;;  %p180_p4 = scmp.eq.s32.totalorder %s655_s26, 2 }
   0x8   : > { %s994_s30 = scalar_select %p161_p1, %s913_s23, %s163_s28  }
   0x9   : > { %p996_p5 = por %p174_p2, %p173_p0  ;;  %p1000_p6 = por %p180_p4, %p179_p3 }
   0xa   : > { %p658_p7 = scmp.ge.s32.totalorder %s917_s24, 1  ;;  %p218_p8 = scmp.lt.s32.totalorder %s917_s24, 4 }
   0xc   : > { %p219_p9 = pnand %p658_p7, %p218_p8 }
   0xd   : > { %v280_v0 = vld [vmem:[%s1224_s1 + $0x80] sm:$0xff] (!%p219_p9)  ;;  %v281_v1 = vld [vmem:[%s1224_s1 + $0x88] sm:$0xff] (!%p219_p9)  ;;  %p252_p10 = scmp.lt.s32.totalorder (!%p219_p9), %s979_s25, 2  ;;  %v282_v5 = vld [vmem:[%s1224_s1 + $0x90] sm:$0xff] (!%p219_p9)  ;;  %v919_v7 = vmov (!%p219_p9), 0.0|0.0   ;;  %vm920_vm0 = vmmov (!%p219_p9), 0  }
   0xe   : > { %222 = sbr.rel (%p219_p9) target bundleno = 484 (0x1e4), region = 40  ;;  %v264_v2 = vld [vmem:[%s1224_s1] sm:$0xff] (!%p219_p9)  ;;  %v759_v3 = vpack.c.bf16 (!%p219_p9), %v281_v1, %v280_v0  ;;  %v265_v4 = vld [vmem:[%s1224_s1 + $0x8] sm:$0xff] (!%p219_p9)  ;;  %v283_v6 = vld [vmem:[%s1224_s1 + $0x98] sm:$0xff] (!%p219_p9)  ;;  %791 = vmatprep.subr.bf16.mxu1 (!%p219_p9), %v919_v7  ;;  %v921_v13 = vmov (!%p219_p9), 0.0   ;;  %vm311_vm1 = vcmask (!%p219_p9), 523264  }
   0xf   : > { %v761_v8 = vpack.c.bf16 (!%p219_p9), %v265_v4, %v264_v2  ;;  %v763_v9 = vpack.c.bf16 (!%p219_p9), %v283_v6, %v282_v5  ;;  %v266_v10 = vld [vmem:[%s1224_s1 + $0x10] sm:$0xff] (!%p219_p9)  ;;  %v267_v11 = vld [vmem:[%s1224_s1 + $0x18] sm:$0xff] (!%p219_p9)  ;;  %v284_v12 = vld [vmem:[%s1224_s1 + $0xa0] sm:$0xff] (!%p219_p9)  ;;  %739 = vmatprep.mubr.msk.f32.mxu1 (!%p219_p9), %vm920_vm0, %v921_v13  ;;  %vm475_vm2 = vcmask (!%p219_p9), 1041408   ;;  %s249_s15 = sand.u32 (!%p219_p9), 1, %s909_s22   ;;  %vm456_vm3 = vcmask (!%p219_p9), 408576  }
  0x10   : > { %760 = vmatprep.subr.bf16.mxu0 (!%p219_p9), %v759_v3  ;;  %v285_v14 = vld [vmem:[%s1224_s1 + $0xa8] sm:$0xff] (!%p219_p9)  ;;  %v765_v15 = vpack.c.bf16 (!%p219_p9), %v267_v11, %v266_v10  ;;  %v268_v17 = vld [vmem:[%s1224_s1 + $0x20] sm:$0xff] (!%p219_p9)  ;;  %v286_v19 = vld [vmem:[%s1224_s1 + $0xb0] sm:$0xff] (!%p219_p9)  ;;  %s668_s17 = sshll.u32 (!%p219_p9), %s979_s25, 7  ;;  %s556_s9 = scalar_lea.sflag (!%p219_p9), [#allocation3], %s249_s15 }
  0x11   : > { %762 = vmatpush3.bf16.msra.mxu0 (!%p219_p9), %v761_v8  ;;  %v767_v16 = vpack.c.bf16 (!%p219_p9), %v285_v14, %v284_v12  ;;  %v269_v18 = vld [vmem:[%s1224_s1 + $0x28] sm:$0xff] (!%p219_p9)  ;;  %v287_v20 = vld [vmem:[%s1224_s1 + $0xb8] sm:$0xff] (!%p219_p9)  ;;  %v296_v22 = vld [vmem:[%s1224_s1 + $0x100] sm:$0xff] (!%p219_p9)  ;;  %s1180_s28 = scalar_lea.hbm (!%p219_p9), %s1229_s6, %s668_s17  ;;  %s922_s10 = smov (!%p219_p9), [#allocation2]  }
  0x12   : > { %764 = vmatprep.subr.bf16.mxu0 (!%p219_p9), %v763_v9  ;;  %v769_v21 = vpack.c.bf16 (!%p219_p9), %v269_v18, %v268_v17  ;;  %v297_v23 = vld [vmem:[%s1224_s1 + $0x108] sm:$0xff] (!%p219_p9)  ;;  %v771_v24 = vpack.c.bf16 (!%p219_p9), %v287_v20, %v286_v19  ;;  %v270_v25 = vld [vmem:[%s1224_s1 + $0x30] sm:$0xff] (!%p219_p9)  ;;  %v271_v26 = vld [vmem:[%s1224_s1 + $0x38] sm:$0xff] (!%p219_p9)  ;;  %s859_s11 = sshll.u32 (!%p219_p9), %s922_s10, 4  ;;  %s860_s11 = int_to_ptr.vmem [resolvable:$false] %s859_s11 }
  0x13   : > { %v288_v27 = vld [vmem:[%s1224_s1 + $0xc0] sm:$0xff] (!%p219_p9)  ;;  %v792_v28 = vpack.c.bf16 (!%p219_p9), %v297_v23, %v296_v22  ;;  %v289_v29 = vld [vmem:[%s1224_s1 + $0xc8] sm:$0xff] (!%p219_p9)  ;;  %v298_v30 = vld [vmem:[%s1224_s1 + $0x110] sm:$0xff] (!%p219_p9)  ;;  %v773_v33 = vpack.c.bf16 (!%p219_p9), %v271_v26, %v270_v25  ;;  %s861_s13 = scalar_lea.vmem (!%p219_p9), %s860_s11, 256 }
  0x14   : > { %v299_v31 = vld [vmem:[%s1224_s1 + $0x118] sm:$0xff] (!%p219_p9)  ;;  %v300_v34 = vld [vmem:[%s1224_s1 + $0x120] sm:$0xff] (!%p219_p9)  ;;  %v301_v35 = vld [vmem:[%s1224_s1 + $0x128] sm:$0xff] (!%p219_p9)  ;;  %v775_v37 = vpack.c.bf16 (!%p219_p9), %v289_v29, %v288_v27 }
  0x15   : > { %s1036_s12 = scalar_select %p252_p10, %s979_s25, 2  ;;  %766 = vmatpush3.bf16.msra.mxu0 %v765_v15  ;;  %793 = vmatpush3.bf16.msra.mxu1 %v792_v28  ;;  %v795_v32 = vpack.c.bf16 %v299_v31, %v298_v30  ;;  %v272_v38 = vld [vmem:[%s1224_s1 + $0x40] sm:$0xff]  ;;  %v273_v39 = vld [vmem:[%s1224_s1 + $0x48] sm:$0xff]  ;;  %v290_v40 = vld [vmem:[%s1224_s1 + $0xd0] sm:$0xff]  ;;  %v798_v42 = vpack.c.bf16 %v301_v35, %v300_v34 }
  0x16   : > { %768 = vmatprep.subr.bf16.mxu0 %v767_v16  ;;  %794 = vmatprep.subr.bf16.mxu1 %v919_v7  ;;  %v291_v41 = vld [vmem:[%s1224_s1 + $0xd8] sm:$0xff]  ;;  %v777_v43 = vpack.c.bf16 %v273_v39, %v272_v38  ;;  %v302_v44 = vld [vmem:[%s1224_s1 + $0x130] sm:$0xff]  ;;  %v292_v49 = vld [vmem:[%s1224_s1 + $0xe0] sm:$0xff] }
  0x17   : > { %s812_s19 = smul.u32 24, %s1036_s12  ;;  %v303_v45 = vld [vmem:[%s1224_s1 + $0x138] sm:$0xff]  ;;  %v779_v46 = vpack.c.bf16 %v291_v41, %v290_v40  ;;  %v274_v47 = vld [vmem:[%s1224_s1 + $0x50] sm:$0xff]  ;;  %v293_v50 = vld [vmem:[%s1224_s1 + $0xe8] sm:$0xff] }
  0x18   : > { %v275_v48 = vld [vmem:[%s1224_s1 + $0x58] sm:$0xff]  ;;  %v801_v51 = vpack.c.bf16 %v303_v45, %v302_v44  ;;  %v458_v53 = vld [vmem:[%s1226_s3] sm:$0xff]  ;;  %v459_v54 = vld [vmem:[%s1226_s3 + $0x8] sm:$0xff]  ;;  %v783_v55 = vpack.c.bf16 %v293_v50, %v292_v49 }
  0x19   : > { %s1074_s29 = scalar_lea.vmem %s1223_s0, %s812_s19  ;;  %770 = vmatpush3.bf16.msra.mxu0 %v769_v21  ;;  %796 = vmatpush3.bf16.msra.mxu1 %v795_v32  ;;  %v781_v52 = vpack.c.bf16 %v275_v48, %v274_v47  ;;  %v276_v56 = vld [vmem:[%s1224_s1 + $0x60] sm:$0xff]  ;;  %v277_v57 = vld [vmem:[%s1224_s1 + $0x68] sm:$0xff]  ;;  %v294_v58 = vld [vmem:[%s1224_s1 + $0xf0] sm:$0xff]  ;;  %v804_v61 = vpack.c.bf16 %v459_v54, %v458_v53  ;;  %s659_s19 = sshll.u32 %s249_s15, 3 }
  0x1a   : > { %v262_v36 = vld [vmem:[%s1074_s29 + $0x8] sm:$0xff]  ;;  %772 = vmatprep.subr.bf16.mxu0 %v771_v24  ;;  %797 = vmatprep.subr.bf16.mxu1 %v919_v7  ;;  %v295_v59 = vld [vmem:[%s1224_s1 + $0xf8] sm:$0xff]  ;;  %v263_v60 = vld [vmem:[%s1074_s29 + $0x10] sm:$0xff]  ;;  %v785_v62 = vpack.c.bf16 %v277_v57, %v276_v56  ;;  %s251_s16 = scalar_lea.vmem [#allocation2], %s659_s19 }
  0x1b   : > { %379 = vmatprep.mubr.f32.mxu0 %v262_v36  ;;  %v787_v63 = vpack.c.bf16 %v295_v59, %v294_v58  ;;  %v278_v0 = vld [vmem:[%s1224_s1 + $0x70] sm:$0xff]  ;;  %v279_v1 = vld [vmem:[%s1224_s1 + $0x78] sm:$0xff]  ;;  %v261_v3 = vld [vmem:[%s1074_s29] sm:$0xff]  ;;  %s572_s18 = sshll.u32 %s251_s16, 4  ;;  %s573_s18 = int_to_ptr.vmem [resolvable:$true] %s572_s18 }
  0x1c   : > { %v789_v2 = vpack.c.bf16 %v279_v1, %v278_v0  ;;  %v460_v4 = vld [vmem:[%s1226_s3 + $0x10] sm:$0xff]  ;;  %v461_v5 = vld [vmem:[%s1226_s3 + $0x18] sm:$0xff]  ;;  %v462_v8 = vld [vmem:[%s1226_s3 + $0x20] sm:$0xff]  ;;  %s855_s29 = scalar_lea.vmem %s573_s18, 128  ;;  %p862_p0 = scmp.lt.s32.totalorder %s573_s18, %s860_s11 }
  0x1d   : > { %774 = vmatpush3.bf16.msra.mxu0 %v773_v33  ;;  %799 = vmatpush3.bf16.msra.mxu1 %v798_v42  ;;  %v807_v6 = vpack.c.bf16 %v461_v5, %v460_v4  ;;  %v463_v9 = vld [vmem:[%s1226_s3 + $0x28] sm:$0xff]  ;;  %v464_v11 = vld [vmem:[%s1226_s3 + $0x30] sm:$0x3]  ;;  %v662_v16 = vld [vmem:[%s1225_s2] ss:$0 sm:$0xff]  ;;  %p856_p11 = scmp.ne.s32.totalorder %s573_s18, %s855_s29  ;;  %p863_p1 = scmp.lt.s32.totalorder %s861_s13, %s855_s29 }
  0x1e   : > { %776 = vmatprep.subr.bf16.mxu0 %v775_v37  ;;  %800 = vmatprep.subr.bf16.mxu1 %v919_v7  ;;  %v810_v10 = vpack.c.bf16 %v463_v9, %v462_v8 }
  0x1f   : > { %p857_p12 = pnand %p856_p11, %p996_p5  ;;  %p864_p2 = por %p863_p1, %p862_p0 }
  0x21   : > { %778 = vmatpush3.bf16.msra.mxu0 %v777_v43  ;;  %802 = vmatpush3.bf16.msra.mxu1 %v801_v51  ;;  %p858_p13 = pneg %p857_p12 }
  0x22   : > { %780 = vmatprep.subr.bf16.mxu0 %v779_v46  ;;  %803 = vmatprep.subr.bf16.mxu1 %v919_v7 }
  0x23   : > { %p865_p3 = pnand %p864_p2, %p858_p13 }
  0x24   : > { %740 = vmatmul.mubr.msk.f32.vlgmr.msra.gmra.mrb[0].mxu1 %vm311_vm1, %v263_v60 }
  0x25   : > { %782 = vmatpush3.bf16.msra.mxu0 %v781_v52  ;;  %805 = vmatpush3.bf16.msra.mxu1 %v804_v61 }
  0x26   : > { %784 = vmatprep.subr.bf16.mxu0 %v783_v55  ;;  %756 = vmatprep.mubr.msk.f32.mxu1 %vm920_vm0, %v921_v13 }
  0x27   : > { %806 = vmatprep.subr.bf16.mxu1 %v919_v7 }
  0x29   : > { %786 = vmatpush3.bf16.msra.mxu0 %v785_v62  ;;  %808 = vmatpush3.bf16.msra.mxu1 %v807_v6 }
  0x2a   : > { %788 = vmatprep.subr.bf16.mxu0 %v787_v63  ;;  %809 = vmatprep.subr.bf16.mxu1 %v919_v7 }
  0x2d   : > { %790 = vmatpush3.bf16.msra.mxu0 %v789_v2  ;;  %811 = vmatpush3.bf16.msra.mxu1 %v810_v10 }
  0x2e   : > { %754 = vmatprep.subr.mxu1 %v921_v13 }
  0x30   : > { %380 = vmatmul.mubr.f32.vlgmr.msra.gmra.mrb[0].mxu0 %v261_v3 }
  0x31   : > { %755 = vmatpush3.msk.msra.mxu1 %vm475_vm2, %v464_v11 }
  0xf7   : > { %v451_v7 = vpop.f32.mrb[0].mxu1 }
  0xf8   : > { %v741_v12 = vpop.f32.mrb[1].mxu1 }
 0x103   : > { %v703_v14 = vpop.f32.mrb[0].mxu0 }
 0x104   : > { %v704_v15 = vpop.f32.mrb[1].mxu0 }
 0x105   : > { %v705_v17 = vadd.f32 %v704_v15, %v703_v14 }
 0x107   : > { %v382_v18 = vadd.f32 %v705_v17, %v662_v16 }
 0x109   : > { %v452_v13 = vadd.f32 %v451_v7, %v382_v18 }
 0x10b   : > { %v455_v19 = vmax.f32 %v452_v13, 0.0 }
 0x10d   : > { %757 = vmatmul.mubr.msk.f32.vlgmr.msra.gmra.mrb[2].mxu1 %vm456_vm3, %v455_v19  ;;  %457 = vst.msk [vmem:[%s251_s16] sm:$0xff] %vm456_vm3, %v455_v19 }
 0x10e   : > { %868 = shalt.err (!%p865_p3)
}
 0x10f   : > { %s869_s25 = scalar_lea.hbm %s1180_s28, 128  ;;  %s873_s19 = scalar_lea.hbm %s1229_s6, 384 }
 0x110   : > { %p870_p4 = scmp.ne.s32.totalorder %s1180_s28, %s869_s25  ;;  %p874_p9 = scmp.lt.u32.totalorder %s1180_s28, %s1229_s6 }
 0x111   : > { %p875_p10 = scmp.lt.u32.totalorder %s873_s19, %s869_s25  ;;  %p877_p12 = scmp.lt.u32.totalorder %s869_s25, %s1180_s28 }
 0x112   : > { %p871_p7 = pnand %p870_p4, %p996_p5 }
 0x113   : > { %p876_p11 = por %p875_p10, %p874_p9 }
 0x114   : > { %p872_p8 = pneg %p871_p7 }
 0x115   : > { %p878_p13 = por %p877_p12, %p876_p11 }
 0x117   : > { %p879_p0 = pnand %p878_p13, %p872_p8 }
 0x119   : > { %882 = shalt.err (!%p879_p0)
}
 0x11a   : > { %813 = dma.vmem_to_hbm [thread:$0]  (%p996_p5), %s573_s18, 128, %s1180_s28, %s556_s9   ;;  %v664_v20 = vld [vmem:[%s1227_s4] ss:$0 sm:$0xff]  ;;  %vm549_vm4 = vcmask 80896  }
 0x11b   : > { %s661_s20 = sshll.u32 %s1036_s12, 3 }
 0x11c   : > { %s260_s13 = scalar_lea.vmem %s1228_s5, %s661_s20 }
 0x1e0   : > { %v545_v21 = vpop.f32.mrb[2].mxu1 }
 0x1e1   : > { %v546_v22 = vadd.f32 %v664_v20, %v545_v21  ;;  %v758_v23 = vpop.f32.mrb[3].mxu1 }
 0x1e3   : > { %550 = vst.msk [vmem:[%s260_s13] sm:$0xff] %vm549_vm4, %v546_v22 }
 0x1e4 PF: > { %p819_p1 = scmp.ge.s32.totalorder %s917_s24, 2  ;;  %s591_s7 = sand.u32 1, %s905_s21  }
 0x1e5   : > { %s592_s12 = scalar_lea.sflag [#allocation3], %s591_s7 }
 0x1e6   : > { %p816_p5 = pnand %p819_p1, %p1000_p6 }
 0x1e8   : > { %900 = dma.done.wait (!%p816_p5), %s592_s12, 128  }
 0x1e9   : > { %902 = vsyncadd (!%p816_p5), %s592_s12, 4294967168  ;;  %p17_p2 = scmp.ge.s32.totalorder %s983_s27, 5   ;;  %s1232_s21 = smov %s909_s22 }
 0x1ea   : > { %s1233_s22 = smov %s913_s23  ;;  %s1234_s23 = smov %s994_s30 }
 0x1eb   : > { %s1235_s24 = smov %s983_s27  ;;  %19 = sbr.rel (!%p17_p2) target bundleno = 3 (0x3), region = 87 }
 0x1f2   :  { %597 = vsyncpa [#allocation3], 1 }
 0x1f3   :  { %599 = vsyncpa [#allocation3 + $0x1], 1 }

</bundles_post_ra>
